<compile_context>
chip_gen: v6e
topology: v6e:2x2x1
jax: 0.10.0
libtpu: 0.0.40
codegen_flags: <defaults>
</compile_context>

<pallas_src>
import jax
import jax.numpy as jnp
from jax.experimental import pallas as pl
from jax.experimental.pallas import tpu as pltpu

HIDDEN = 64      # logical hidden width (matches nn.Linear(.., 64))
HID_PAD = 128    # hidden padded to lane width
OUT_PAD = 128    # env_actions padded to lane width


def _round_up(n, m):
    return ((n + m - 1) // m) * m


def mlp_kernel(x_ref, w1_ref, b1_ref, w2_ref, b2_ref, w3_ref, b3_ref, o_ref):
    # Hoist bias loads off the MXU -> EUP -> MXU critical chain.
    b1 = b1_ref[...]
    b2 = b2_ref[...]
    b3 = b3_ref[...]

    # f32 -> bf16 cast happens in-kernel (VPU filler hidden under the MXU).
    x = x_ref[...].astype(jnp.bfloat16)  # (TM, IN)

    # bf16 MXU passes, f32 accumulation; tanh + bias adds in f32 (v5e-safe).
    h1 = jnp.tanh(
        jnp.dot(x, w1_ref[...], preferred_element_type=jnp.float32) + b1
    )
    h2 = jnp.tanh(
        jnp.dot(h1.astype(jnp.bfloat16), w2_ref[...],
                preferred_element_type=jnp.float32) + b2
    )
    out = jnp.dot(h2.astype(jnp.bfloat16), w3_ref[...],
                  preferred_element_type=jnp.float32) + b3
    o_ref[...] = out.astype(o_ref.dtype)


def mlp_forward(x, padded_params, env_actions, *, tm=None):
    """x: (B, input_shape) f32.  Returns (B, env_actions) f32."""
    w1, b1, w2, b2, w3, b3 = padded_params
    B, in_dim = x.shape

    # TM: >=16 rows (bf16 sublane packing), up to 256 (v6e/v7x 256-wide MXU).
    if tm is None:
        tm = min(256, _round_up(B, 16))
    n_blocks = pl.cdiv(B, tm)
    padded_b = n_blocks * tm
    if padded_b != B:
        x = jnp.pad(x, ((0, padded_b - B), (0, 0)))

    def resident(arr):  # whole array, VMEM-resident across all grid steps
        return pl.BlockSpec(arr.shape, lambda i: (0,) * arr.ndim)

    flops = 2 * B * (in_dim * HID_PAD + HID_PAD * HID_PAD + HID_PAD * OUT_PAD)
    transcendentals = 2 * B * HID_PAD
    bytes_accessed = (
        padded_b * in_dim * 4                       # x (f32)
        + (w1.size + w2.size + w3.size) * 2         # bf16 weights
        + (b1.size + b2.size + b3.size) * 4         # f32 biases
        + padded_b * OUT_PAD * 4                    # f32 output slab
    )

    out_padded = pl.pallas_call(
        mlp_kernel,
        out_shape=jax.ShapeDtypeStruct((padded_b, OUT_PAD), jnp.float32),
        grid=(n_blocks,),
        in_specs=[
            pl.BlockSpec((tm, in_dim), lambda i: (i, 0)),   # x: pipelined
            resident(w1), resident(b1),
            resident(w2), resident(b2),
            resident(w3), resident(b3),
        ],
        out_specs=pl.BlockSpec((tm, OUT_PAD), lambda i: (i, 0)),
        compiler_params=pltpu.CompilerParams(
            dimension_semantics=("parallel",)),             # megacore on v7x
        cost_estimate=pl.CostEstimate(
            flops=flops,
            transcendentals=transcendentals,
            bytes_accessed=bytes_accessed),
    )(x, w1, b1, w2, b2, w3, b3)

    return out_padded[:B, :env_actions]


def init_params(key, input_shape, env_actions, hidden=HIDDEN):
    # PyTorch nn.Linear-style init: U(-1/sqrt(fan_in), 1/sqrt(fan_in)).
    keys = jax.random.split(key, 6)

    def linear(kw, kb, fan_in, fan_out):
        bound = 1.0 / jnp.sqrt(float(fan_in))
        w = jax.random.uniform(kw, (fan_in, fan_out), jnp.float32, -bound, bound)
        b = jax.random.uniform(kb, (fan_out,), jnp.float32, -bound, bound)
        return w, b

    w1, b1 = linear(keys[0], keys[1], input_shape, hidden)
    w2, b2 = linear(keys[2], keys[3], hidden, hidden)
    w3, b3 = linear(keys[4], keys[5], hidden, env_actions)
    return (w1, b1, w2, b2, w3, b3)


def pad_params(params):
    """Zero-pad hidden/output feature dims to 128 lanes; weights -> bf16,
    biases stay f32.  The input feature dim (K) is left unpadded.

    Zero pad rows/cols are exact in bf16, and tanh(0) = 0, so padding
    propagates zeros and the sliced output is numerically the unpadded model
    (up to bf16 rounding of the real weights)."""
    w1, b1, w2, b2, w3, b3 = params

    def pad_w(w, rows, cols):
        out = jnp.zeros((rows, cols), jnp.float32)
        out = out.at[: w.shape[0], : w.shape[1]].set(w)
        return out.astype(jnp.bfloat16)

    def pad_b(b, cols):
        out = jnp.zeros((1, cols), jnp.float32)
        return out.at[0, : b.shape[0]].set(b)

    w1p = pad_w(w1, w1.shape[0], HID_PAD)   # (input_shape, 128)
    w2p = pad_w(w2, HID_PAD, HID_PAD)       # (128, 128)
    w3p = pad_w(w3, HID_PAD, OUT_PAD)       # (128, 128)
    b1p = pad_b(b1, HID_PAD)
    b2p = pad_b(b2, HID_PAD)
    b3p = pad_b(b3, OUT_PAD)
    return (w1p, b1p, w2p, b2p, w3p, b3p)


def reference_forward(x, params):
    # Pure-f32 reference of the original PyTorch module semantics.
    w1, b1, w2, b2, w3, b3 = params
    h = jnp.tanh(x @ w1 + b1)
    h = jnp.tanh(h @ w2 + b2)
    return h @ w3 + b3


if __name__ == "__main__":
    key = jax.random.PRNGKey(0)
    k_x, k_p = jax.random.split(key)

    batch = 8          # small demo batch; wrapper pads rows to TM internally
    input_shape = 32   # MLPNet(input_shape=32, ...)
    env_actions = 8    # MLPNet(..., env_actions=8)

    x = jax.random.normal(k_x, (batch, input_shape), jnp.float32)
    params = init_params(k_p, input_shape, env_actions)
    padded_params = pad_params(params)

    out = mlp_forward(x, padded_params, env_actions)
    out = jax.block_until_ready(out)

    ref = reference_forward(x, params)
    assert out.shape == (batch, env_actions)
    assert bool(jnp.all(jnp.isfinite(out)))
    # Tolerance relaxed for bf16 MXU operands (f32 accumulation).
    assert jnp.allclose(out, ref, atol=5e-2, rtol=5e-2), "mismatch vs reference"

    print("KERNEL_OK")
</pallas_src>

<mosaic_0001>
module attributes {stable_mosaic.version = 11 : i64} {
  func.func @mlp_kernel(%arg0: i32, %arg1: memref<16x32xf32, #tpu.memory_space<vmem>>, %arg2: memref<32x128xbf16, #tpu.memory_space<vmem>>, %arg3: memref<1x128xf32, #tpu.memory_space<vmem>>, %arg4: memref<128x128xbf16, #tpu.memory_space<vmem>>, %arg5: memref<1x128xf32, #tpu.memory_space<vmem>>, %arg6: memref<128x128xbf16, #tpu.memory_space<vmem>>, %arg7: memref<1x128xf32, #tpu.memory_space<vmem>>, %arg8: memref<16x128xf32, #tpu.memory_space<vmem>>) attributes {dimension_semantics = [#tpu.dimension_semantics<parallel>], iteration_bounds = array<i64: 1>, scalar_prefetch = 0 : i64, scratch_operands = 0 : i64, tpu.core_type = #tpu.core_type<tc>, window_params = [{transform_indices = @transform_0, window_bounds = array<i64: 16, 32>}, {pipeline_mode = #tpu.pipeline_mode<synchronous>, transform_indices = @transform_1, window_bounds = array<i64: 32, 128>}, {pipeline_mode = #tpu.pipeline_mode<synchronous>, transform_indices = @transform_2, window_bounds = array<i64: 1, 128>}, {pipeline_mode = #tpu.pipeline_mode<synchronous>, transform_indices = @transform_3, window_bounds = array<i64: 128, 128>}, {pipeline_mode = #tpu.pipeline_mode<synchronous>, transform_indices = @transform_4, window_bounds = array<i64: 1, 128>}, {pipeline_mode = #tpu.pipeline_mode<synchronous>, transform_indices = @transform_5, window_bounds = array<i64: 128, 128>}, {pipeline_mode = #tpu.pipeline_mode<synchronous>, transform_indices = @transform_6, window_bounds = array<i64: 1, 128>}, {transform_indices = @transform_7, window_bounds = array<i64: 16, 128>}]} {
    %c0 = arith.constant 0 : index
    %c0_0 = arith.constant 0 : index
    %0 = vector.load %arg3[%c0, %c0_0] : memref<1x128xf32, #tpu.memory_space<vmem>>, vector<1x128xf32>
    %c0_1 = arith.constant 0 : index
    %c0_2 = arith.constant 0 : index
    %1 = vector.load %arg5[%c0_1, %c0_2] : memref<1x128xf32, #tpu.memory_space<vmem>>, vector<1x128xf32>
    %c0_3 = arith.constant 0 : index
    %c0_4 = arith.constant 0 : index
    %2 = vector.load %arg7[%c0_3, %c0_4] : memref<1x128xf32, #tpu.memory_space<vmem>>, vector<1x128xf32>
    %c0_5 = arith.constant 0 : index
    %c0_6 = arith.constant 0 : index
    %3 = vector.load %arg1[%c0_5, %c0_6] : memref<16x32xf32, #tpu.memory_space<vmem>>, vector<16x32xf32>
    %4 = arith.truncf %3 : vector<16x32xf32> to vector<16x32xbf16>
    %c0_7 = arith.constant 0 : index
    %c0_8 = arith.constant 0 : index
    %5 = vector.load %arg2[%c0_7, %c0_8] : memref<32x128xbf16, #tpu.memory_space<vmem>>, vector<32x128xbf16>
    %cst = arith.constant dense<0.000000e+00> : vector<16x128xf32>
    %6 = tpu.matmul %4, %5, %cst {dimension_numbers = #tpu.dot_dimension_numbers<[1], [0], [0], [1], [0, 0, 1, 1], [], []>} : vector<16x32xbf16>, vector<32x128xbf16>, vector<16x128xf32> -> vector<16x128xf32>
    %7 = vector.broadcast %0 : vector<1x128xf32> to vector<16x128xf32>
    %8 = arith.addf %6, %7 : vector<16x128xf32>
    %9 = math.tanh %8 : vector<16x128xf32>
    %10 = arith.truncf %9 : vector<16x128xf32> to vector<16x128xbf16>
    %c0_9 = arith.constant 0 : index
    %c0_10 = arith.constant 0 : index
    %11 = vector.load %arg4[%c0_9, %c0_10] : memref<128x128xbf16, #tpu.memory_space<vmem>>, vector<128x128xbf16>
    %cst_11 = arith.constant dense<0.000000e+00> : vector<16x128xf32>
    %12 = tpu.matmul %10, %11, %cst_11 {dimension_numbers = #tpu.dot_dimension_numbers<[1], [0], [0], [1], [0, 0, 1, 1], [], []>} : vector<16x128xbf16>, vector<128x128xbf16>, vector<16x128xf32> -> vector<16x128xf32>
    %13 = vector.broadcast %1 : vector<1x128xf32> to vector<16x128xf32>
    %14 = arith.addf %12, %13 : vector<16x128xf32>
    %15 = math.tanh %14 : vector<16x128xf32>
    %16 = arith.truncf %15 : vector<16x128xf32> to vector<16x128xbf16>
    %c0_12 = arith.constant 0 : index
    %c0_13 = arith.constant 0 : index
    %17 = vector.load %arg6[%c0_12, %c0_13] : memref<128x128xbf16, #tpu.memory_space<vmem>>, vector<128x128xbf16>
    %cst_14 = arith.constant dense<0.000000e+00> : vector<16x128xf32>
    %18 = tpu.matmul %16, %17, %cst_14 {dimension_numbers = #tpu.dot_dimension_numbers<[1], [0], [0], [1], [0, 0, 1, 1], [], []>} : vector<16x128xbf16>, vector<128x128xbf16>, vector<16x128xf32> -> vector<16x128xf32>
    %19 = vector.broadcast %2 : vector<1x128xf32> to vector<16x128xf32>
    %20 = arith.addf %18, %19 : vector<16x128xf32>
    %c0_15 = arith.constant 0 : index
    %c0_16 = arith.constant 0 : index
    %21 = vector.load %arg8[%c0_15, %c0_16] : memref<16x128xf32, #tpu.memory_space<vmem>>, vector<16x128xf32>
    tpu.vector_store %arg8[%c0_15, %c0_16], %20 {strides = array<i32>} : memref<16x128xf32, #tpu.memory_space<vmem>>, vector<16x128xf32>,
    return
  }
  func.func @transform_0(%arg0: i32) -> (i32, i32) {
    %c0_i32 = arith.constant 0 : i32
    %c0_i32_0 = arith.constant 0 : i32
    return %arg0, %c0_i32 : i32, i32
  }
  func.func @transform_1(%arg0: i32) -> (i32, i32) {
    %c0_i32 = arith.constant 0 : i32
    %c0_i32_0 = arith.constant 0 : i32
    %c0_i32_1 = arith.constant 0 : i32
    return %c0_i32, %c0_i32_0 : i32, i32
  }
  func.func @transform_2(%arg0: i32) -> (i32, i32) {
    %c0_i32 = arith.constant 0 : i32
    %c0_i32_0 = arith.constant 0 : i32
    %c0_i32_1 = arith.constant 0 : i32
    return %c0_i32, %c0_i32_0 : i32, i32
  }
  func.func @transform_3(%arg0: i32) -> (i32, i32) {
    %c0_i32 = arith.constant 0 : i32
    %c0_i32_0 = arith.constant 0 : i32
    %c0_i32_1 = arith.constant 0 : i32
    return %c0_i32, %c0_i32_0 : i32, i32
  }
  func.func @transform_4(%arg0: i32) -> (i32, i32) {
    %c0_i32 = arith.constant 0 : i32
    %c0_i32_0 = arith.constant 0 : i32
    %c0_i32_1 = arith.constant 0 : i32
    return %c0_i32, %c0_i32_0 : i32, i32
  }
  func.func @transform_5(%arg0: i32) -> (i32, i32) {
    %c0_i32 = arith.constant 0 : i32
    %c0_i32_0 = arith.constant 0 : i32
    %c0_i32_1 = arith.constant 0 : i32
    return %c0_i32, %c0_i32_0 : i32, i32
  }
  func.func @transform_6(%arg0: i32) -> (i32, i32) {
    %c0_i32 = arith.constant 0 : i32
    %c0_i32_0 = arith.constant 0 : i32
    %c0_i32_1 = arith.constant 0 : i32
    return %c0_i32, %c0_i32_0 : i32, i32
  }
  func.func @transform_7(%arg0: i32) -> (i32, i32) {
    %c0_i32 = arith.constant 0 : i32
    %c0_i32_0 = arith.constant 0 : i32
    return %arg0, %c0_i32 : i32, i32
  }
}

</mosaic_0001>

<bundles_post_ra>
// kernel: tpu_custom_call.1
= control target key start
LH: loop header
LB: loop body
LE: loop exit
PB: predicated region body
PF: predicated region fallthrough
CT: control target
= control target key end

     0   :  { %12 = vsyncpa [#allocation3], 0  ;;  %s755_s0 = inlined_call_operand.hbm [shape: f32[16,32], index: 0, kind: input, shape index: {}]   ;;  %s756_s1 = inlined_call_operand.hbm [shape: bf16[32,128], index: 1, kind: input, shape index: {}]   ;;  %s757_s2 = inlined_call_operand.vmem [shape: f32[1,128], index: 2, kind: input, shape index: {}]   ;;  %s758_s3 = inlined_call_operand.hbm [shape: bf16[128,128], index: 3, kind: input, shape index: {}]   ;;  %s759_s4 = inlined_call_operand.vmem [shape: f32[1,128], index: 4, kind: input, shape index: {}]   ;;  %s760_s5 = inlined_call_operand.hbm [shape: bf16[128,128], index: 5, kind: input, shape index: {}]   ;;  %s761_s6 = inlined_call_operand.vmem [shape: f32[1,128], index: 6, kind: input, shape index: {}]   ;;  %s762_s7 = inlined_call_operand.hbm [shape: f32[16,128], index: 7, kind: output, shape index: {}]  }
   0x1   :  { %13 = vsyncpa [#allocation6], 0 }
   0x2   :  { %14 = vsyncpa [#allocation9], 0 }
   0x3   :  { %15 = vsyncpa [#allocation4], 0  ;;  %s641_s24 = smov [#allocation5]  }
   0x4   :  { %s33_s25 = sshll.u32 %s641_s24, 4  ;;  %s34_s25 = int_to_ptr.vmem [resolvable:$true] %s33_s25 }
   0x5   :  { %s541_s26 = scalar_lea.vmem %s34_s25, 256  ;;  %p546_p1 = scmp.lt.s32.totalorder %s34_s25, %s34_s25 }
   0x6   :  { %p542_p0 = scmp.ne.s32.totalorder %s34_s25, %s541_s26  ;;  %p547_p2 = scmp.lt.s32.totalorder %s541_s26, %s541_s26 }
   0x8   :  { %p548_p3 = por %p547_p2, %p546_p1 }
   0xa   :  { %p549_p4 = pnand %p548_p3, %p542_p0 }
   0xc   :  { %552 = shalt.err (!%p549_p4)
}
   0xd   :  { %s642_s27 = smov 64   ;;  %s643_s28 = smov 4  }
   0xe   :  { %39 = dma.hbm_to_vmem [thread:$0]  %s756_s1, 256, %s34_s25, [#allocation6], %s642_s27, %s642_s27, %s643_s28  }
   0xf   :  { %s644_s8 = smov [#allocation2]  }
  0x10   :  { %s21_s9 = sshll.u32 %s644_s8, 4  ;;  %s22_s9 = int_to_ptr.vmem [resolvable:$true] %s21_s9 }
  0x11   :  { %s561_s10 = scalar_lea.vmem %s22_s9, 256  ;;  %p566_p6 = scmp.lt.s32.totalorder %s22_s9, %s22_s9 }
  0x12   :  { %p562_p5 = scmp.ne.s32.totalorder %s22_s9, %s561_s10  ;;  %p567_p7 = scmp.lt.s32.totalorder %s561_s10, %s561_s10 }
  0x14   :  { %p568_p8 = por %p567_p7, %p566_p6 }
  0x16   :  { %p569_p9 = pnand %p568_p8, %p562_p5 }
  0x18   :  { %572 = shalt.err (!%p569_p9)
}
  0x19   :  { %s645_s11 = smov 128   ;;  %s646_s12 = smov 8  }
  0x1a   :  { %27 = dma.hbm_to_vmem [thread:$0]  %s755_s0, 256, %s22_s9, [#allocation3], %s645_s11, %s645_s11, %s646_s12  }
  0x1b   :  { %s647_s1 = smov [#allocation7]   ;;  %s648_s16 = smov [#allocation8]  }
  0x1c   :  { %s47_s15 = sshll.u32 %s647_s1, 4  ;;  %s61_s17 = sshll.u32 %s648_s16, 4  ;;  %s48_s15 = int_to_ptr.vmem [resolvable:$true] %s47_s15  ;;  %s62_s17 = int_to_ptr.vmem [resolvable:$true] %s61_s17 }
  0x1d   :  { %s581_s18 = scalar_lea.vmem %s48_s15, 1024  ;;  %p586_p11 = scmp.lt.s32.totalorder %s48_s15, %s48_s15 }
  0x1e   :  { %p582_p10 = scmp.ne.s32.totalorder %s48_s15, %s581_s18  ;;  %p587_p12 = scmp.lt.s32.totalorder %s581_s18, %s581_s18 }
  0x20   :  { %p588_p13 = por %p587_p12, %p586_p11 }
  0x22   :  { %p589_p0 = pnand %p588_p13, %p582_p10 }
  0x24   :  { %592 = shalt.err (!%p589_p0)
}
  0x25   :  { %53 = dma.hbm_to_vmem [thread:$0]  %s758_s3, 1024, %s48_s15, [#allocation6], %s642_s27, %s642_s27, %s643_s28  }
  0x26   :  { %s601_s0 = scalar_lea.vmem %s62_s17, 1024  ;;  %p606_p2 = scmp.lt.s32.totalorder %s62_s17, %s62_s17 }
  0x27   :  { %p602_p1 = scmp.ne.s32.totalorder %s62_s17, %s601_s0  ;;  %p607_p3 = scmp.lt.s32.totalorder %s601_s0, %s601_s0 }
  0x29   :  { %p608_p4 = por %p607_p3, %p606_p2 }
  0x2b   :  { %p609_p5 = pnand %p608_p4, %p602_p1 }
  0x2d   :  { %612 = shalt.err (!%p609_p5)
}
  0x2e   :  { %67 = dma.hbm_to_vmem [thread:$0]  %s760_s5, 1024, %s62_s17, [#allocation9], %s642_s27, %s642_s27, %s643_s28  }
  0x2f   :  { %633 = dma.done.wait [#allocation3], 256  }
  0x30   :  { %634 = vsyncadd [#allocation3], 4294967040 }
  0x31   :  { %635 = dma.done.wait [#allocation6], 1280  }
  0x32   :  { %636 = vsyncadd [#allocation6], 4294966016 }
  0x33   :  { %637 = dma.done.wait [#allocation9], 1024  }
  0x34   :  { %638 = vsyncadd [#allocation9], 4294966272  ;;  %v649_v0 = vmov 0.0   ;;  %vm650_vm0 = vmmov 0   ;;  %v507_v1 = vld [vmem:[#allocation5 + $0x8] sm:$0xff]   ;;  %v508_v2 = vld [vmem:[#allocation5] sm:$0xff]  }
  0x35   :  { %448 = vmatprep.subr.bf16.mxu0 %v649_v0  ;;  %452 = vmatprep.mubr.msk.bf16.mxu0 %vm650_vm0, %v649_v0  ;;  %v86_v3 = vld [vmem:[#allocation2] sm:$0xff]  ;;  %v87_v4 = vld [vmem:[#allocation2 + $0x8] sm:$0xff]  ;;  %v509_v5 = vld [vmem:[#allocation7 + $0x38] sm:$0xff]   ;;  %vm111_vm1 = vcmask 261120  }
  0x36   :  { %456 = vmatprep.subr.bf16.mxu1 %v649_v0  ;;  %472 = vmatprep.mubr.msk.bf16.mxu1 %vm650_vm0, %v649_v0  ;;  %v510_v6 = vld [vmem:[#allocation7 + $0x30] sm:$0xff]   ;;  %v88_v7 = vpack.c.bf16 %v87_v4, %v86_v3  ;;  %v511_v8 = vld [vmem:[#allocation7 + $0x28] sm:$0xff]   ;;  %v512_v9 = vld [vmem:[#allocation7 + $0x20] sm:$0xff]  }
  0x37   :  { %449 = vmatpush3.bf16.msra.mxu0 %v507_v1  ;;  %457 = vmatpush3.bf16.msra.mxu1 %v509_v5  ;;  %v513_v10 = vld [vmem:[#allocation7 + $0x18] sm:$0xff]   ;;  %v514_v11 = vld [vmem:[#allocation7 + $0x10] sm:$0xff]   ;;  %v515_v12 = vld [vmem:[#allocation7 + $0x8] sm:$0xff]  }
  0x38   :  { %450 = vmatprep.subr.bf16.mxu0 %v649_v0  ;;  %458 = vmatprep.subr.bf16.mxu1 %v649_v0  ;;  %v516_v13 = vld [vmem:[#allocation7] sm:$0xff]   ;;  %v517_v14 = vld [vmem:[#allocation8 + $0x38] sm:$0xff]   ;;  %v518_v15 = vld [vmem:[#allocation8 + $0x30] sm:$0xff]  }
  0x39   :  { %v405_v16 = vld [vmem:[%s757_s2] ss:$0 sm:$0xff]  ;;  %v519_v26 = vld [vmem:[#allocation8 + $0x28] sm:$0xff]   ;;  %v521_v28 = vld [vmem:[#allocation8 + $0x18] sm:$0xff]  }
  0x3a   :  { %v520_v27 = vld [vmem:[#allocation8 + $0x20] sm:$0xff]   ;;  %v522_v29 = vld [vmem:[#allocation8 + $0x10] sm:$0xff]   ;;  %v523_v30 = vld [vmem:[#allocation8 + $0x8] sm:$0xff]  }
  0x3b   :  { %451 = vmatpush3.bf16.msra.mxu0 %v508_v2  ;;  %459 = vmatpush3.bf16.msra.mxu1 %v510_v6  ;;  %v524_v31 = vld [vmem:[#allocation8] sm:$0xff]  }
  0x3c   :  { %476 = vmatprep.subr.bf16.mxu0 %v649_v0  ;;  %460 = vmatprep.subr.bf16.mxu1 %v649_v0  ;;  %v409_v32 = vld [vmem:[%s759_s4] ss:$0 sm:$0xff]  ;;  %s651_s4 = smov [#allocation10]  }
  0x3d   :  { %v418_v42 = vld [vmem:[%s761_s6] ss:$0 sm:$0xff]  ;;  %s391_s26 = sshll.u32 %s651_s4, 4  ;;  %s392_s26 = int_to_ptr.vmem [resolvable:$true] %s391_s26 }
  0x3e   :  { %453 = vmatmul.mubr.msk.bf16.vlgmr.msra.gmra.mxu0 %vm111_vm1, %v88_v7  ;;  %s613_s27 = scalar_lea.vmem %s392_s26, 256  ;;  %p618_p7 = scmp.lt.s32.totalorder %s392_s26, %s392_s26 }
  0x3f   :  { %492 = vmatprep.mubr.msk.bf16.mxu0 %vm650_vm0, %v649_v0  ;;  %461 = vmatpush3.bf16.msra.mxu1 %v511_v8  ;;  %p614_p6 = scmp.ne.s32.totalorder %s392_s26, %s613_s27  ;;  %p619_p8 = scmp.lt.s32.totalorder %s613_s27, %s613_s27 }
  0x40   :  { %462 = vmatprep.subr.bf16.mxu1 %v649_v0  ;;  %477 = vmatpush3.bf16.msra.mxu0 %v517_v14 }
  0x41   :  { %478 = vmatprep.subr.bf16.mxu0 %v649_v0  ;;  %p620_p9 = por %p619_p8, %p618_p7 }
  0x43   :  { %463 = vmatpush3.bf16.msra.mxu1 %v512_v9  ;;  %p621_p10 = pnand %p620_p9, %p614_p6 }
  0x44   :  { %464 = vmatprep.subr.bf16.mxu1 %v649_v0  ;;  %479 = vmatpush3.bf16.msra.mxu0 %v518_v15 }
  0x45   :  { %480 = vmatprep.subr.bf16.mxu0 %v649_v0 }
  0x47   :  { %465 = vmatpush3.bf16.msra.mxu1 %v513_v10 }
  0x48   :  { %466 = vmatprep.subr.bf16.mxu1 %v649_v0  ;;  %481 = vmatpush3.bf16.msra.mxu0 %v519_v26 }
  0x49   :  { %482 = vmatprep.subr.bf16.mxu0 %v649_v0 }
  0x4b   :  { %467 = vmatpush3.bf16.msra.mxu1 %v514_v11 }
  0x4c   :  { %468 = vmatprep.subr.bf16.mxu1 %v649_v0  ;;  %483 = vmatpush3.bf16.msra.mxu0 %v520_v27 }
  0x4d   :  { %484 = vmatprep.subr.bf16.mxu0 %v649_v0 }
  0x4f   :  { %469 = vmatpush3.bf16.msra.mxu1 %v515_v12 }
  0x50   :  { %470 = vmatprep.subr.bf16.mxu1 %v649_v0  ;;  %485 = vmatpush3.bf16.msra.mxu0 %v521_v28 }
  0x51   :  { %486 = vmatprep.subr.bf16.mxu0 %v649_v0 }
  0x53   :  { %471 = vmatpush3.bf16.msra.mxu1 %v516_v13 }
  0x54   :  { %487 = vmatpush3.bf16.msra.mxu0 %v522_v29 }
  0x55   :  { %488 = vmatprep.subr.bf16.mxu0 %v649_v0 }
  0x58   :  { %489 = vmatpush3.bf16.msra.mxu0 %v523_v30 }
  0x59   :  { %490 = vmatprep.subr.bf16.mxu0 %v649_v0 }
  0x5c   :  { %491 = vmatpush3.bf16.msra.mxu0 %v524_v31 }
  0xfe   :  { %v149_v17 = vpop.f32.mrf.mxu0 }
  0xff   :  { %v150_v18 = vadd.f32 %v405_v16, %v149_v17 }
 0x100   :  { %v454_v19 = vpop.f32.mrf.mxu0 }
 0x101   :  { %525 = vtanh.f32 %v150_v18 }
 0x102   :  { %v152_v20 = vpop.f32.mrf.mxu0 }
 0x103   :  { %v153_v21 = vadd.f32 %v405_v16, %v152_v20 }
 0x104   :  { %v455_v22 = vpop.f32.mrf.mxu0 }
 0x105   :  { %527 = vtanh.f32 %v153_v21 }
 0x10e   :  { %v526_v23 = vpop.eup %525 }
 0x112   :  { %v528_v24 = vpop.eup %527 }
 0x113   :  { %v158_v25 = vpack.c.bf16 %v528_v24, %v526_v23 }
 0x115   :  { %473 = vmatmul.mubr.bf16.vlgmr.msra.gmra.mxu1 %v158_v25 }
 0x1d5   :  { %v263_v33 = vpop.f32.mrf.mxu1 }
 0x1d6   :  { %v264_v34 = vadd.f32 %v409_v32, %v263_v33 }
 0x1d7   :  { %v474_v35 = vpop.f32.mrf.mxu1 }
 0x1d8   :  { %529 = vtanh.f32 %v264_v34 }
 0x1d9   :  { %v266_v36 = vpop.f32.mrf.mxu1 }
 0x1da   :  { %v267_v37 = vadd.f32 %v409_v32, %v266_v36 }
 0x1db   :  { %v475_v38 = vpop.f32.mrf.mxu1 }
 0x1dc   :  { %531 = vtanh.f32 %v267_v37 }
 0x1e5   :  { %v530_v39 = vpop.eup %529 }
 0x1e9   :  { %v532_v40 = vpop.eup %531 }
 0x1ea   :  { %v272_v41 = vpack.c.bf16 %v532_v40, %v530_v39 }
 0x1ec   :  { %493 = vmatmul.mubr.bf16.vlgmr.msra.gmra.mxu0 %v272_v41 }
 0x2ac   :  { %v377_v43 = vpop.f32.mrf.mxu0 }
 0x2ad   :  { %v378_v44 = vadd.f32 %v418_v42, %v377_v43 }
 0x2ae   :  { %v494_v45 = vpop.f32.mrf.mxu0 }
 0x2af   :  { %384 = vst [vmem:[#allocation10] sm:$0xff] %v378_v44 }
 0x2b0   :  { %v380_v46 = vpop.f32.mrf.mxu0 }
 0x2b1   :  { %v381_v47 = vadd.f32 %v418_v42, %v380_v46 }
 0x2b2   :  { %v495_v48 = vpop.f32.mrf.mxu0 }
 0x2b3   :  { %385 = vst [vmem:[#allocation10 + $0x8] sm:$0xff] %v381_v47 }
 0x2b4   :  { %624 = shalt.err (!%p621_p10)
}
 0x2b5   :  { %397 = dma.vmem_to_hbm [thread:$0]  %s392_s26, 256, %s762_s7, [#allocation4], %s645_s11, %s645_s11, %s646_s12  }
 0x2b6   :  { %639 = dma.done.wait [#allocation4], 256  }
 0x2b7   :  { %640 = vsyncadd [#allocation4], 4294967040 }
 0x2b8   :  { %401 = vsyncpa [#allocation3], 1 }
 0x2b9   :  { %402 = vsyncpa [#allocation6], 1 }
 0x2ba   :  { %403 = vsyncpa [#allocation9], 1 }
 0x2bb   :  { %404 = vsyncpa [#allocation4], 1 }

</bundles_post_ra>
